<compile_context>
chip_gen: v5e
topology: v5e:2x2
jax: 0.10.0
libtpu: 0.0.40
codegen_flags: <defaults>
</compile_context>

<pallas_src>
import jax
import jax.numpy as jnp
from jax.experimental import pallas as pl
from jax.experimental.pallas import tpu as pltpu

HIDDEN = 128
LANE = 128
ROW_ALIGN = 16  # sublane multiple that is safe for both bf16 (16,128) and f32 (8,128) tiles


def _round_up(a, m):
    return ((a + m - 1) // m) * m


def policy_mlp_kernel(x_ref, w1_ref, b1_ref, w2_ref, b2_ref, w3_ref, b3_ref, o_ref):
    # fc1 + relu: x and weights are already bf16 (pre-cast in the wrapper/prep step);
    # MXU accumulates in f32, bias add / ReLU stay in f32.
    h1 = jnp.dot(x_ref[...], w1_ref[...], preferred_element_type=jnp.float32) + b1_ref[...]
    h1 = jnp.maximum(h1, 0.0)

    # fc2 + relu
    h2 = jnp.dot(h1.astype(jnp.bfloat16), w2_ref[...],
                 preferred_element_type=jnp.float32) + b2_ref[...]
    h2 = jnp.maximum(h2, 0.0)

    # fc3 (lane-dense: padded to 128 output columns at prep time) + stable softmax in f32.
    # Padded bias entries are jnp.finfo(f32).min so their exp underflows to exactly 0.
    logits = jnp.dot(h2.astype(jnp.bfloat16), w3_ref[...],
                     preferred_element_type=jnp.float32) + b3_ref[...]
    m = jnp.max(logits, axis=-1, keepdims=True)
    e = jnp.exp(logits - m)
    denom = jnp.sum(e, axis=-1, keepdims=True)
    probs = e / denom  # exact divide: rows sum to 1 to f32 precision (consumers may sample/log)

    # Store only the real classes -> (tb, output_dim) masked store; cuts HBM writeback ~32x
    # vs. writing the padded 128-wide f32 block.
    o_ref[...] = probs[:, : o_ref.shape[-1]].astype(o_ref.dtype)


def prepare_params(params):
    """One-time parameter prep (hoisted out of the per-call forward):
    - cast weights to bf16 (halves weight DMA / VMEM, removes per-step in-kernel casts),
    - pad fc3 to a multiple-of-128 output width (lane-dense MXU op); padded weight
      columns are 0 and padded bias entries are f32 min so softmax ignores them."""
    w3 = params["w3"]
    b3 = params["b3"]
    output_dim = w3.shape[1]
    n_pad = max(LANE, _round_up(output_dim, LANE))
    if n_pad != output_dim:
        w3 = jnp.pad(w3, ((0, 0), (0, n_pad - output_dim)))
        b3 = jnp.pad(b3, ((0, 0), (0, n_pad - output_dim)),
                     constant_values=float(jnp.finfo(jnp.float32).min))
    return {
        "w1": params["w1"].astype(jnp.bfloat16), "b1": params["b1"],
        "w2": params["w2"].astype(jnp.bfloat16), "b2": params["b2"],
        "w3": w3.astype(jnp.bfloat16), "b3": b3,
        "output_dim": output_dim,
    }


def policy_network_forward(x, prepped, *, block_b=1024):
    """x: (B, input_dim) float32. prepped: output of prepare_params (bf16 weights,
    f32 biases, fc3 padded to a lane-dense width)."""
    w1, b1, w2, b2, w3p, b3p = (prepped[k] for k in ("w1", "b1", "w2", "b2", "w3", "b3"))
    output_dim = prepped["output_dim"]
    B, input_dim = x.shape

    # Cast the activations once in the wrapper (halves input HBM read vs. f32).
    x = x.astype(jnp.bfloat16)

    # Batch tiling: tb is a multiple of 16 rows, capped at block_b AND at ~ceil(B/2) so
    # that any non-trivial batch produces >= 2 grid steps (both v7x TensorCores get work).
    half = _round_up(pl.cdiv(B, 2), ROW_ALIGN)
    tb = max(ROW_ALIGN, min(block_b, half))
    b_pad = _round_up(B, tb)
    if b_pad != B:
        x = jnp.pad(x, ((0, b_pad - B), (0, 0)))
    grid = (b_pad // tb,)

    def whole(arr):
        # Whole-array block, constant index_map -> fetched once, resident in VMEM.
        return pl.BlockSpec(arr.shape, lambda i: (0, 0))

    out = pl.pallas_call(
        policy_mlp_kernel,
        out_shape=jax.ShapeDtypeStruct((b_pad, output_dim), jnp.float32),
        grid=grid,
        in_specs=[
            pl.BlockSpec((tb, input_dim), lambda i: (i, 0)),
            whole(w1), whole(b1),
            whole(w2), whole(b2),
            whole(w3p), whole(b3p),
        ],
        out_specs=pl.BlockSpec((tb, output_dim), lambda i: (i, 0)),
        compiler_params=pltpu.CompilerParams(dimension_semantics=("parallel",)),
    )(x, w1, b1, w2, b2, w3p, b3p)

    # Slice off batch padding rows; the fake padded classes were never written.
    return out[:B]


def reference_forward(x, params):
    h1 = jnp.maximum(x @ params["w1"] + params["b1"], 0.0)
    h2 = jnp.maximum(h1 @ params["w2"] + params["b2"], 0.0)
    logits = h2 @ params["w3"] + params["b3"]
    return jax.nn.softmax(logits, axis=-1)


def init_params(key, input_dim, output_dim):
    """Deterministic init mimicking nn.Linear's uniform(-1/sqrt(fan_in), 1/sqrt(fan_in)).
    Weights stored as (in_features, out_features) (transposed vs PyTorch)."""
    keys = jax.random.split(key, 6)

    def linear(kw, kb, fan_in, fan_out):
        bound = 1.0 / jnp.sqrt(jnp.float32(fan_in))
        w = jax.random.uniform(kw, (fan_in, fan_out), jnp.float32, -bound, bound)
        b = jax.random.uniform(kb, (1, fan_out), jnp.float32, -bound, bound)
        return w, b

    w1, b1 = linear(keys[0], keys[1], input_dim, HIDDEN)
    w2, b2 = linear(keys[2], keys[3], HIDDEN, HIDDEN)
    w3, b3 = linear(keys[4], keys[5], HIDDEN, output_dim)
    return {"w1": w1, "b1": b1, "w2": w2, "b2": b2, "w3": w3, "b3": b3}


if __name__ == "__main__":
    key = jax.random.PRNGKey(0)
    k_params, k_x1, k_x2 = jax.random.split(key, 3)

    input_dim = 16
    output_dim = 4
    params = init_params(k_params, input_dim, output_dim)
    prepped = prepare_params(params)  # one-time prep: bf16 weights + lane-dense fc3 padding

    # Small case (B=2): single-tile path (batch padded up to the 16-row tile).
    x_small = jax.random.normal(k_x1, (2, input_dim), jnp.float32)
    out_small = jax.block_until_ready(policy_network_forward(x_small, prepped))
    ref_small = reference_forward(x_small, params)
    assert out_small.shape == (2, output_dim)
    assert bool(jnp.allclose(jnp.sum(out_small, axis=-1), 1.0, atol=1e-3))
    assert bool(jnp.allclose(out_small, ref_small, atol=3e-2)), "small-batch mismatch vs reference"

    # Larger case (B=300, block_b=128): batch grid (3 steps) + tail-padding path.
    x_big = jax.random.normal(k_x2, (300, input_dim), jnp.float32)
    out_big = jax.block_until_ready(policy_network_forward(x_big, prepped, block_b=128))
    ref_big = reference_forward(x_big, params)
    assert out_big.shape == (300, output_dim)
    assert bool(jnp.allclose(jnp.sum(out_big, axis=-1), 1.0, atol=1e-3))
    assert bool(jnp.allclose(out_big, ref_big, atol=3e-2)), "tiled-batch mismatch vs reference"

    # Default block_b=1024: tb is capped at ~B/2 so grid == 2 (both v7x TCs participate).
    out_big2 = jax.block_until_ready(policy_network_forward(x_big, prepped))
    assert bool(jnp.allclose(out_big2, ref_big, atol=3e-2)), "default-tile mismatch vs reference"

    # TODO(synk): for tiny-batch RL inference this standalone call is launch/DMA-overhead bound;
    # keep weights resident across calls (cross-call VMEM+semaphore future) or fuse this MLP
    # into the caller's kernel for real deployments.
    print("KERNEL_OK")
</pallas_src>

<mosaic_0001>
module attributes {stable_mosaic.version = 11 : i64} {
  func.func @policy_mlp_kernel(%arg0: i32, %arg1: memref<16x16xbf16, #tpu.memory_space<vmem>>, %arg2: memref<16x128xbf16, #tpu.memory_space<vmem>>, %arg3: memref<1x128xf32, #tpu.memory_space<vmem>>, %arg4: memref<128x128xbf16, #tpu.memory_space<vmem>>, %arg5: memref<1x128xf32, #tpu.memory_space<vmem>>, %arg6: memref<128x128xbf16, #tpu.memory_space<vmem>>, %arg7: memref<1x128xf32, #tpu.memory_space<vmem>>, %arg8: memref<16x4xf32, #tpu.memory_space<vmem>>) attributes {dimension_semantics = [#tpu.dimension_semantics<parallel>], iteration_bounds = array<i64: 1>, scalar_prefetch = 0 : i64, scratch_operands = 0 : i64, tpu.core_type = #tpu.core_type<tc>, window_params = [{transform_indices = @transform_0, window_bounds = array<i64: 16, 16>}, {pipeline_mode = #tpu.pipeline_mode<synchronous>, transform_indices = @transform_1, window_bounds = array<i64: 16, 128>}, {pipeline_mode = #tpu.pipeline_mode<synchronous>, transform_indices = @transform_2, window_bounds = array<i64: 1, 128>}, {pipeline_mode = #tpu.pipeline_mode<synchronous>, transform_indices = @transform_3, window_bounds = array<i64: 128, 128>}, {pipeline_mode = #tpu.pipeline_mode<synchronous>, transform_indices = @transform_4, window_bounds = array<i64: 1, 128>}, {pipeline_mode = #tpu.pipeline_mode<synchronous>, transform_indices = @transform_5, window_bounds = array<i64: 128, 128>}, {pipeline_mode = #tpu.pipeline_mode<synchronous>, transform_indices = @transform_6, window_bounds = array<i64: 1, 128>}, {transform_indices = @transform_7, window_bounds = array<i64: 16, 4>}]} {
    %c0 = arith.constant 0 : index
    %c0_0 = arith.constant 0 : index
    %0 = vector.load %arg1[%c0, %c0_0] : memref<16x16xbf16, #tpu.memory_space<vmem>>, vector<16x16xbf16>
    %c0_1 = arith.constant 0 : index
    %c0_2 = arith.constant 0 : index
    %1 = vector.load %arg2[%c0_1, %c0_2] : memref<16x128xbf16, #tpu.memory_space<vmem>>, vector<16x128xbf16>
    %cst = arith.constant dense<0.000000e+00> : vector<16x128xf32>
    %2 = tpu.matmul %0, %1, %cst {dimension_numbers = #tpu.dot_dimension_numbers<[1], [0], [0], [1], [0, 0, 1, 1], [], []>} : vector<16x16xbf16>, vector<16x128xbf16>, vector<16x128xf32> -> vector<16x128xf32>
    %c0_3 = arith.constant 0 : index
    %c0_4 = arith.constant 0 : index
    %3 = vector.load %arg3[%c0_3, %c0_4] : memref<1x128xf32, #tpu.memory_space<vmem>>, vector<1x128xf32>
    %4 = vector.broadcast %3 : vector<1x128xf32> to vector<16x128xf32>
    %5 = arith.addf %2, %4 : vector<16x128xf32>
    %cst_5 = arith.constant 0.000000e+00 : f32
    %6 = vector.broadcast %cst_5 : f32 to vector<16x128xf32>
    %7 = arith.maximumf %5, %6 : vector<16x128xf32>
    %8 = arith.truncf %7 : vector<16x128xf32> to vector<16x128xbf16>
    %c0_6 = arith.constant 0 : index
    %c0_7 = arith.constant 0 : index
    %9 = vector.load %arg4[%c0_6, %c0_7] : memref<128x128xbf16, #tpu.memory_space<vmem>>, vector<128x128xbf16>
    %cst_8 = arith.constant dense<0.000000e+00> : vector<16x128xf32>
    %10 = tpu.matmul %8, %9, %cst_8 {dimension_numbers = #tpu.dot_dimension_numbers<[1], [0], [0], [1], [0, 0, 1, 1], [], []>} : vector<16x128xbf16>, vector<128x128xbf16>, vector<16x128xf32> -> vector<16x128xf32>
    %c0_9 = arith.constant 0 : index
    %c0_10 = arith.constant 0 : index
    %11 = vector.load %arg5[%c0_9, %c0_10] : memref<1x128xf32, #tpu.memory_space<vmem>>, vector<1x128xf32>
    %12 = vector.broadcast %11 : vector<1x128xf32> to vector<16x128xf32>
    %13 = arith.addf %10, %12 : vector<16x128xf32>
    %cst_11 = arith.constant 0.000000e+00 : f32
    %14 = vector.broadcast %cst_11 : f32 to vector<16x128xf32>
    %15 = arith.maximumf %13, %14 : vector<16x128xf32>
    %16 = arith.truncf %15 : vector<16x128xf32> to vector<16x128xbf16>
    %c0_12 = arith.constant 0 : index
    %c0_13 = arith.constant 0 : index
    %17 = vector.load %arg6[%c0_12, %c0_13] : memref<128x128xbf16, #tpu.memory_space<vmem>>, vector<128x128xbf16>
    %cst_14 = arith.constant dense<0.000000e+00> : vector<16x128xf32>
    %18 = tpu.matmul %16, %17, %cst_14 {dimension_numbers = #tpu.dot_dimension_numbers<[1], [0], [0], [1], [0, 0, 1, 1], [], []>} : vector<16x128xbf16>, vector<128x128xbf16>, vector<16x128xf32> -> vector<16x128xf32>
    %c0_15 = arith.constant 0 : index
    %c0_16 = arith.constant 0 : index
    %19 = vector.load %arg7[%c0_15, %c0_16] : memref<1x128xf32, #tpu.memory_space<vmem>>, vector<1x128xf32>
    %20 = vector.broadcast %19 : vector<1x128xf32> to vector<16x128xf32>
    %21 = arith.addf %18, %20 : vector<16x128xf32>
    %cst_17 = arith.constant dense<0xFF800000> : vector<16xf32>
    %22 = vector.multi_reduction <maximumf>, %21, %cst_17 [1] : vector<16x128xf32> to vector<16xf32>
    %23 = vector.shape_cast %22 : vector<16xf32> to vector<16x1xf32>
    %24 = vector.broadcast %23 : vector<16x1xf32> to vector<16x128xf32>
    %25 = arith.subf %21, %24 : vector<16x128xf32>
    %26 = math.exp %25 : vector<16x128xf32>
    %cst_18 = arith.constant dense<0.000000e+00> : vector<16xf32>
    %27 = vector.multi_reduction <add>, %26, %cst_18 [1] : vector<16x128xf32> to vector<16xf32>
    %28 = vector.shape_cast %27 : vector<16xf32> to vector<16x1xf32>
    %29 = vector.broadcast %28 : vector<16x1xf32> to vector<16x128xf32>
    %30 = arith.divf %26, %29 : vector<16x128xf32>
    %31 = vector.extract_strided_slice %30 {offsets = [0, 0], sizes = [16, 4], strides = [1, 1]} : vector<16x128xf32> to vector<16x4xf32>
    %c0_19 = arith.constant 0 : index
    %c0_20 = arith.constant 0 : index
    %32 = vector.load %arg8[%c0_19, %c0_20] : memref<16x4xf32, #tpu.memory_space<vmem>>, vector<16x4xf32>
    tpu.vector_store %arg8[%c0_19, %c0_20], %31 {strides = array<i32>} : memref<16x4xf32, #tpu.memory_space<vmem>>, vector<16x4xf32>,
    return
  }
  func.func @transform_0(%arg0: i32) -> (i32, i32) {
    %c0_i32 = arith.constant 0 : i32
    %c0_i32_0 = arith.constant 0 : i32
    return %arg0, %c0_i32 : i32, i32
  }
  func.func @transform_1(%arg0: i32) -> (i32, i32) {
    %c0_i32 = arith.constant 0 : i32
    %c0_i32_0 = arith.constant 0 : i32
    %c0_i32_1 = arith.constant 0 : i32
    return %c0_i32, %c0_i32_0 : i32, i32
  }
  func.func @transform_2(%arg0: i32) -> (i32, i32) {
    %c0_i32 = arith.constant 0 : i32
    %c0_i32_0 = arith.constant 0 : i32
    %c0_i32_1 = arith.constant 0 : i32
    return %c0_i32, %c0_i32_0 : i32, i32
  }
  func.func @transform_3(%arg0: i32) -> (i32, i32) {
    %c0_i32 = arith.constant 0 : i32
    %c0_i32_0 = arith.constant 0 : i32
    %c0_i32_1 = arith.constant 0 : i32
    return %c0_i32, %c0_i32_0 : i32, i32
  }
  func.func @transform_4(%arg0: i32) -> (i32, i32) {
    %c0_i32 = arith.constant 0 : i32
    %c0_i32_0 = arith.constant 0 : i32
    %c0_i32_1 = arith.constant 0 : i32
    return %c0_i32, %c0_i32_0 : i32, i32
  }
  func.func @transform_5(%arg0: i32) -> (i32, i32) {
    %c0_i32 = arith.constant 0 : i32
    %c0_i32_0 = arith.constant 0 : i32
    %c0_i32_1 = arith.constant 0 : i32
    return %c0_i32, %c0_i32_0 : i32, i32
  }
  func.func @transform_6(%arg0: i32) -> (i32, i32) {
    %c0_i32 = arith.constant 0 : i32
    %c0_i32_0 = arith.constant 0 : i32
    %c0_i32_1 = arith.constant 0 : i32
    return %c0_i32, %c0_i32_0 : i32, i32
  }
  func.func @transform_7(%arg0: i32) -> (i32, i32) {
    %c0_i32 = arith.constant 0 : i32
    %c0_i32_0 = arith.constant 0 : i32
    return %arg0, %c0_i32 : i32, i32
  }
}

</mosaic_0001>

<bundles_post_ra>
// kernel: tpu_custom_call.1
= control target key start
LH: loop header
LB: loop body
LE: loop exit
PB: predicated region body
PF: predicated region fallthrough
CT: control target
= control target key end

     0   :  { %12 = vsyncpa [#allocation3], 0  ;;  %s636_s0 = inlined_call_operand.hbm [shape: bf16[16,16], index: 0, kind: input, shape index: {}]   ;;  %s637_s1 = inlined_call_operand.hbm [shape: bf16[16,128], index: 1, kind: input, shape index: {}]   ;;  %s638_s2 = inlined_call_operand.vmem [shape: f32[1,128], index: 2, kind: input, shape index: {}]   ;;  %s639_s3 = inlined_call_operand.hbm [shape: bf16[128,128], index: 3, kind: input, shape index: {}]   ;;  %s640_s4 = inlined_call_operand.vmem [shape: f32[1,128], index: 4, kind: input, shape index: {}]   ;;  %s641_s5 = inlined_call_operand.hbm [shape: bf16[128,128], index: 5, kind: input, shape index: {}]   ;;  %s642_s6 = inlined_call_operand.vmem [shape: f32[1,128], index: 6, kind: input, shape index: {}]   ;;  %s643_s7 = inlined_call_operand.vmem [shape: f32[16,4], index: 7, kind: output, shape index: {}]  }
   0x1   :  { %13 = vsyncpa [#allocation5], 0 }
   0x2   :  { %14 = vsyncpa [#allocation8], 0  ;;  %s32_s26 = sshll.u32 %s637_s1, 4  ;;  %s561_s27 = smov [#allocation4]   ;;  %s33_s26 = int_to_ptr.hbm [resolvable:$true] %s32_s26 }
   0x3   :  { %s34_s28 = sshll.u32 %s561_s27, 4  ;;  %s19_s8 = sshll.u32 %s636_s0, 4  ;;  %s35_s28 = int_to_ptr.vmem [resolvable:$true] %s34_s28  ;;  %s20_s8 = int_to_ptr.hbm [resolvable:$true] %s19_s8 }
   0x4   :  { %s562_s9 = smov 64   ;;  %s563_s10 = smov 4  }
   0x5   :  { %40 = dma.hbm_to_vmem [thread:$0]  %s33_s26, 128, %s35_s28, [#allocation5], %s562_s9, %s562_s9, %s563_s10  }
   0x6   :  { %s564_s11 = smov [#allocation2]   ;;  %s47_s15 = sshll.u32 %s639_s3, 4  ;;  %s48_s15 = int_to_ptr.hbm [resolvable:$true] %s47_s15 }
   0x7   :  { %s21_s12 = sshll.u32 %s564_s11, 4  ;;  %s62_s17 = sshll.u32 %s641_s5, 4  ;;  %s22_s12 = int_to_ptr.vmem [resolvable:$true] %s21_s12  ;;  %s63_s17 = int_to_ptr.hbm [resolvable:$true] %s62_s17 }
   0x8   :  { %27 = dma.hbm_to_vmem [thread:$0]  %s20_s8, 128, %s22_s12, [#allocation3], %s562_s9, %s562_s9, %s563_s10  }
   0x9   :  { %s565_s18 = smov [#allocation6]   ;;  %s566_s0 = smov [#allocation7]  }
   0xa   :  { %s49_s19 = sshll.u32 %s565_s18, 4  ;;  %s64_s20 = sshll.u32 %s566_s0, 4  ;;  %s50_s19 = int_to_ptr.vmem [resolvable:$true] %s49_s19  ;;  %s65_s20 = int_to_ptr.vmem [resolvable:$true] %s64_s20 }
   0xb   :  { %55 = dma.hbm_to_vmem [thread:$0]  %s48_s15, 1024, %s50_s19, [#allocation5], %s562_s9, %s562_s9, %s563_s10  }
   0xc   :  { %70 = dma.hbm_to_vmem [thread:$0]  %s63_s17, 1024, %s65_s20, [#allocation8], %s562_s9, %s562_s9, %s563_s10  }
   0xd   :  { %555 = dma.done.wait [#allocation3], 128  }
   0xe   :  { %556 = vsyncadd [#allocation3], 4294967168 }
   0xf   :  { %557 = dma.done.wait [#allocation5], 1152  }
  0x10   :  { %558 = vsyncadd [#allocation5], 4294966144 }
  0x11   :  { %559 = dma.done.wait [#allocation8], 1024  }
  0x12   :  { %560 = vsyncadd [#allocation8], 4294966272  ;;  %v425_v0 = vld [vmem:[#allocation4] sm:$0xff]  ;;  %v424_v2 = vld [vmem:[#allocation2] sm:$0xff]  ;;  %vm109_vm0 = vcmask 130048   ;;  %vm341_vm5 = vcmask 31744  }
  0x13   :  { %v433_v1 = vld [vmem:[#allocation6 + $0x38] sm:$0xff]  ;;  %120 = vmatpush.bf16.msra.mxu0 %v425_v0  ;;  %v432_v3 = vld [vmem:[#allocation6 + $0x30] sm:$0xff]  ;;  %v431_v4 = vld [vmem:[#allocation6 + $0x28] sm:$0xff] }
  0x14   :  { %198 = vmatpush.bf16.msra.mxu1 %v433_v1  ;;  %v430_v5 = vld [vmem:[#allocation6 + $0x20] sm:$0xff]  ;;  %v429_v6 = vld [vmem:[#allocation6 + $0x18] sm:$0xff]  ;;  %v428_v7 = vld [vmem:[#allocation6 + $0x10] sm:$0xff] }
  0x15   :  { %v427_v8 = vld [vmem:[#allocation6 + $0x8] sm:$0xff]  ;;  %v426_v9 = vld [vmem:[#allocation6] sm:$0xff]  ;;  %v441_v10 = vld [vmem:[#allocation7 + $0x38] sm:$0xff] }
  0x16   :  { %359 = vmatmul.msk.bf16.vlgmr.msra.gmra.mxu0 %vm109_vm0, %v424_v2  ;;  %283 = vmatpush.bf16.msra.mxu2 %v441_v10  ;;  %v440_v11 = vld [vmem:[#allocation7 + $0x30] sm:$0xff]  ;;  %v439_v12 = vld [vmem:[#allocation7 + $0x28] sm:$0xff]  ;;  %v438_v13 = vld [vmem:[#allocation7 + $0x20] sm:$0xff] }
  0x17   :  { %v448_v15 = vld [vmem:[%s638_s2] ss:$0 sm:$0xff]  ;;  %v437_v22 = vld [vmem:[#allocation7 + $0x18] sm:$0xff]  ;;  %v435_v24 = vld [vmem:[#allocation7 + $0x8] sm:$0xff] }
  0x18   :  { %199 = vmatpush.bf16.msra.mxu1 %v432_v3  ;;  %v436_v23 = vld [vmem:[#allocation7 + $0x10] sm:$0xff]  ;;  %v434_v25 = vld [vmem:[#allocation7] sm:$0xff] }
  0x19   :  { %v449_v27 = vld [vmem:[%s640_s4] ss:$0 sm:$0xff] }
  0x1a   :  { %284 = vmatpush.bf16.msra.mxu2 %v440_v11  ;;  %v450_v34 = vld [vmem:[%s642_s6] ss:$0 sm:$0xff] }
  0x1c   :  { %200 = vmatpush.bf16.msra.mxu1 %v431_v4 }
  0x1e   :  { %285 = vmatpush.bf16.msra.mxu2 %v439_v12 }
  0x20   :  { %201 = vmatpush.bf16.msra.mxu1 %v430_v5 }
  0x22   :  { %286 = vmatpush.bf16.msra.mxu2 %v438_v13 }
  0x24   :  { %202 = vmatpush.bf16.msra.mxu1 %v429_v6 }
  0x26   :  { %287 = vmatpush.bf16.msra.mxu2 %v437_v22 }
  0x28   :  { %203 = vmatpush.bf16.msra.mxu1 %v428_v7 }
  0x2a   :  { %288 = vmatpush.bf16.msra.mxu2 %v436_v23 }
  0x2c   :  { %204 = vmatpush.bf16.msra.mxu1 %v427_v8 }
  0x2e   :  { %289 = vmatpush.bf16.msra.mxu2 %v435_v24 }
  0x30   :  { %205 = vmatpush.bf16.msra.mxu1 %v426_v9 }
  0x32   :  { %290 = vmatpush.bf16.msra.mxu2 %v434_v25 }
  0x93   :  { %v122_v14 = vpop.f32.mrf.mxu0 }
  0x94   :  { %v123_v16 = vadd.f32 %v448_v15, %v122_v14 }
  0x96   :  { %v127_v19 = vmax.f32 %v123_v16, 0.0 }
  0x9b   :  { %v124_v17 = vpop.f32.mrf.mxu0 }
  0x9c   :  { %v125_v18 = vadd.f32 %v448_v15, %v124_v17 }
  0x9e   :  { %v128_v20 = vmax.f32 %v125_v18, 0.0 }
  0xa0   :  { %v129_v21 = vpack.c.bf16 %v128_v20, %v127_v19 }
  0xa2   :  { %206 = vmatmul.bf16.vlgmr.msra.gmra.mxu1 %v129_v21 }
 0x11f   :  { %v207_v26 = vpop.f32.mrf.mxu1 }
 0x120   :  { %v208_v28 = vadd.f32 %v449_v27, %v207_v26 }
 0x122   :  { %v212_v31 = vmax.f32 %v208_v28, 0.0 }
 0x127   :  { %v209_v29 = vpop.f32.mrf.mxu1 }
 0x128   :  { %v210_v30 = vadd.f32 %v449_v27, %v209_v29 }
 0x12a   :  { %v213_v32 = vmax.f32 %v210_v30, 0.0 }
 0x12c   :  { %v214_v33 = vpack.c.bf16 %v213_v32, %v212_v31 }
 0x12e   :  { %291 = vmatmul.bf16.vlgmr.msra.gmra.mxu2 %v214_v33 }
 0x1b1   :  { %v292_v35 = vpop.f32.mrf.mxu2 }
 0x1b2   :  { %v293_v36 = vadd.f32 %v450_v34, %v292_v35 }
 0x1b4   :  { %297 = vmax.xlane.f32.xlu0 %v293_v36 }
 0x1b9   :  { %v294_v37 = vpop.f32.mrf.mxu2 }
 0x1ba   :  { %v295_v38 = vadd.f32 %v450_v34, %v294_v37 }
 0x1bc   :  { %299 = vmax.xlane.f32.xlu0 %v295_v38 }
 0x227   :  { %v298_v39 = vpop.xlane.xlu0 %297 }
 0x228   :  { %v301_v40 = vsub.f32 %v293_v36, %v298_v39 }
 0x22a   :  { %v303_v41 = vmul.f32 1.442695, %v301_v40 }
 0x22c   :  { %451 = vpow2.f32 %v303_v41 }
 0x22f   :  { %v300_v42 = vpop.xlane.xlu0 %299 }
 0x230   :  { %v302_v43 = vsub.f32 %v295_v38, %v300_v42 }
 0x232   :  { %v452_v44 = vpop.eup %451  ;;  %v305_v45 = vmul.f32 1.442695, %v302_v43 }
 0x233   :  { %307 = vadd.xlane.f32.xlu1 %v452_v44 }
 0x234   :  { %453 = vpow2.f32 %v305_v45 }
 0x23a   :  { %v454_v46 = vpop.eup %453 }
 0x23b   :  { %309 = vadd.xlane.f32.xlu1 %v454_v46 }
 0x2a6   :  { %v308_v47 = vpop.xlane.xlu1 %307 }
 0x2a7   :  { %455 = vrcp.f32 %v308_v47  ;;  %v322_v52 = vand.u32 2147483648, %v308_v47  ;;  %v320_v54 = vand.u32 2147483647, %v308_v47  ;;  %vm316_vm2 = vweird.f32 %v308_v47 }
 0x2a9   :  { %v323_v57 = vor.u32 1.1754944e-38, %v322_v52  ;;  %vm321_vm4 = vcmp.eq.f32.partialorder %v320_v54, 8.507059e+37 }
 0x2ad   :  { %v456_v48 = vpop.eup %455 }
 0x2ae   :  { %v312_v49 = vmul.f32 %v456_v48, %v308_v47  ;;  %v310_v50 = vpop.xlane.xlu1 %309  ;;  %vm317_vm1 = vweird.f32 %v456_v48 }
 0x2af   :  { %457 = vrcp.f32 %v310_v50  ;;  %vm318_vm3 = vmor %vm316_vm2, %vm317_vm1  ;;  %v337_v63 = vand.u32 2147483648, %v310_v50  ;;  %v335_v1 = vand.u32 2147483647, %v310_v50  ;;  %vm331_vm7 = vweird.f32 %v310_v50 }
 0x2b0   :  { %v313_v51 = vsub.f32 1.0, %v312_v49 }
 0x2b1   :  { %v338_v3 = vor.u32 1.1754944e-38, %v337_v63  ;;  %vm336_vm9 = vcmp.eq.f32.partialorder %v335_v1, 8.507059e+37 }
 0x2b2   :  { %v314_v53 = vmul.f32 %v456_v48, %v313_v51 }
 0x2b4   :  { %v315_v55 = vadd.f32 %v456_v48, %v314_v53 }
 0x2b5   :  { %v458_v56 = vpop.eup %457 }
 0x2b6   :  { %v319_v58 = vsel %vm318_vm3, %v456_v48, %v315_v55  ;;  %v327_v59 = vmul.f32 %v458_v56, %v310_v50  ;;  %vm332_vm6 = vweird.f32 %v458_v56 }
 0x2b7   :  { %v324_v60 = vsel %vm321_vm4, %v323_v57, %v319_v58  ;;  %vm333_vm8 = vmor %vm331_vm7, %vm332_vm6 }
 0x2b8   :  { %v325_v61 = vmul.f32 %v452_v44, %v324_v60  ;;  %v328_v62 = vsub.f32 1.0, %v327_v59 }
 0x2ba   :  { %342 = vst.msk [vmem:[%s643_s7] sm:$0xff] %vm341_vm5, %v325_v61  ;;  %v329_v0 = vmul.f32 %v458_v56, %v328_v62 }
 0x2bc   :  { %v330_v2 = vadd.f32 %v458_v56, %v329_v0 }
 0x2be   :  { %v334_v4 = vsel %vm333_vm8, %v458_v56, %v330_v2 }
 0x2bf   :  { %v339_v5 = vsel %vm336_vm9, %v338_v3, %v334_v4 }
 0x2c0   :  { %v340_v6 = vmul.f32 %v454_v46, %v339_v5 }
 0x2c2   :  { %343 = vst.msk [vmem:[%s643_s7 + $0x8] sm:$0xff] %vm341_vm5, %v340_v6 }
 0x2c3   :  { %348 = vsyncpa [#allocation3], 1 }
 0x2c4   :  { %349 = vsyncpa [#allocation5], 1 }
 0x2c5   :  { %350 = vsyncpa [#allocation8], 1 }

</bundles_post_ra>
